<compile_context>
chip_gen: v5e
topology: v5e:2x2
jax: 0.10.0
libtpu: 0.0.40
codegen_flags: <defaults>
</compile_context>

<pallas_src>
import jax
import jax.numpy as jnp
from jax.experimental import pallas as pl
from jax.experimental.pallas import tpu as pltpu

_LANE = 128          # lanes per vreg (fast axis)
_SUBLANE = 8         # sublanes per vreg (slow axis)
_TILE_BYTES = 4 * 1024 * 1024   # per-tile buffer budget; x2 bufs x (in+out) ~ 16 MiB


def _identity_kernel(x_ref, o_ref):
    # Straight copy of the current lane-dense tile.
    o_ref[...] = x_ref[...]


def _materialized_copy(obs: jax.Array) -> jax.Array:
    """Tiled, lane-dense Pallas copy producing a fresh buffer equal to obs."""
    orig_shape = obs.shape
    dtype = obs.dtype
    itemsize = jnp.dtype(dtype).itemsize

    flat = obs.reshape(-1)
    n = flat.shape[0]

    # Rows of a lane-dense [rows, 128] layout.
    rows = -(-n // _LANE)

    # Tile rows: multiple of 8 sublanes, capped by the VMEM budget per buffer.
    budget_rows = max(_SUBLANE, _TILE_BYTES // (_LANE * itemsize))
    tile_rows = min(rows, budget_rows)
    tile_rows = max(_SUBLANE, (tile_rows // _SUBLANE) * _SUBLANE)

    # Pad so the grid divides evenly (last tile fully valid; pad sliced off after).
    padded_rows = -(-rows // tile_rows) * tile_rows
    padded_n = padded_rows * _LANE
    if padded_n != n:
        flat = jnp.pad(flat, (0, padded_n - n))
    x2d = flat.reshape(padded_rows, _LANE)

    grid = (padded_rows // tile_rows,)

    out2d = pl.pallas_call(
        _identity_kernel,
        out_shape=jax.ShapeDtypeStruct((padded_rows, _LANE), dtype),
        grid=grid,
        in_specs=[pl.BlockSpec((tile_rows, _LANE), lambda i: (i, 0))],
        out_specs=pl.BlockSpec((tile_rows, _LANE), lambda i: (i, 0)),
        compiler_params=pltpu.CompilerParams(
            dimension_semantics=("parallel",)),
        cost_estimate=pl.CostEstimate(
            flops=0,
            transcendentals=0,
            bytes_accessed=2 * padded_n * itemsize),
    )(x2d)

    out_flat = out2d.reshape(-1)
    if padded_n != n:
        out_flat = out_flat[:n]
    return out_flat.reshape(orig_shape)


def identity_encoder_forward(obs: jax.Array, *, materialize: bool = False) -> jax.Array:
    """IdentityEncoder.forward(obs) -> obs.

    Default (hot path): returns obs directly — zero kernel launches, zero HBM
    traffic, exactly matching the PyTorch module semantics.
    materialize=True: runs the tiled Pallas copy kernel and returns a fresh
    buffer with identical values.
    """
    if not materialize:
        return obs
    return _materialized_copy(obs)


class IdentityEncoder:
    """JAX/Pallas port of the PyTorch IdentityEncoder module."""

    def __init__(self, obs_shape):
        assert len(obs_shape) == 1
        self.repr_dim = obs_shape[0]
        # No parameters (module has none).

    def __call__(self, obs, materialize: bool = False):
        return identity_encoder_forward(obs, materialize=materialize)


if __name__ == "__main__":
    key = jax.random.PRNGKey(0)
    B, D = 2, 32  # small shapes: batch=2, repr_dim=32
    obs = jax.random.normal(key, (B, D), dtype=jnp.float32)

    enc = IdentityEncoder((D,))

    # Hot path: pure pass-through (no kernel — this is the recommended usage).
    out_fast = enc(obs)
    assert out_fast.shape == obs.shape and out_fast.dtype == obs.dtype

    # Materialized path: exercise the Pallas copy kernel once.
    out_copy = enc(obs, materialize=True)
    out_copy = jax.block_until_ready(out_copy)

    assert out_copy.shape == obs.shape and out_copy.dtype == obs.dtype
    assert bool(jnp.all(out_copy == obs))
    assert bool(jnp.all(out_fast == obs))
    print("KERNEL_OK")
</pallas_src>

<mosaic_0001>
module attributes {stable_mosaic.version = 11 : i64} {
  func.func @_identity_kernel(%arg0: i32, %arg1: memref<8x128xf32, #tpu.memory_space<vmem>>, %arg2: memref<8x128xf32, #tpu.memory_space<vmem>>) attributes {dimension_semantics = [#tpu.dimension_semantics<parallel>], iteration_bounds = array<i64: 1>, scalar_prefetch = 0 : i64, scratch_operands = 0 : i64, tpu.core_type = #tpu.core_type<tc>, window_params = [{transform_indices = @transform_0, window_bounds = array<i64: 8, 128>}, {transform_indices = @transform_1, window_bounds = array<i64: 8, 128>}]} {
    %c0 = arith.constant 0 : index
    %c0_0 = arith.constant 0 : index
    %0 = vector.load %arg1[%c0, %c0_0] : memref<8x128xf32, #tpu.memory_space<vmem>>, vector<8x128xf32>
    %c0_1 = arith.constant 0 : index
    %c0_2 = arith.constant 0 : index
    %1 = vector.load %arg2[%c0_1, %c0_2] : memref<8x128xf32, #tpu.memory_space<vmem>>, vector<8x128xf32>
    tpu.vector_store %arg2[%c0_1, %c0_2], %0 {strides = array<i32>} : memref<8x128xf32, #tpu.memory_space<vmem>>, vector<8x128xf32>,
    return
  }
  func.func @transform_0(%arg0: i32) -> (i32, i32) {
    %c0_i32 = arith.constant 0 : i32
    %c0_i32_0 = arith.constant 0 : i32
    return %arg0, %c0_i32 : i32, i32
  }
  func.func @transform_1(%arg0: i32) -> (i32, i32) {
    %c0_i32 = arith.constant 0 : i32
    %c0_i32_0 = arith.constant 0 : i32
    return %arg0, %c0_i32 : i32, i32
  }
}

</mosaic_0001>

<bundles_post_ra>
// kernel: tpu_custom_call.1
= control target key start
LH: loop header
LB: loop body
LE: loop exit
PB: predicated region body
PF: predicated region fallthrough
CT: control target
= control target key end

     0   :  { %6 = vsyncpa [#allocation3], 0  ;;  %s114_s0 = inlined_call_operand.hbm [shape: f32[8,128], index: 0, kind: input, shape index: {}]   ;;  %s115_s1 = inlined_call_operand.hbm [shape: f32[8,128], index: 1, kind: output, shape index: {}]  }
   0x1   :  { %7 = vsyncpa [#allocation4], 0  ;;  %s13_s8 = sshll.u32 %s114_s0, 4  ;;  %s96_s9 = smov [#allocation2]   ;;  %s14_s8 = int_to_ptr.hbm [resolvable:$true] %s13_s8 }
   0x2   :  { %s15_s10 = sshll.u32 %s96_s9, 4  ;;  %s16_s10 = int_to_ptr.vmem [resolvable:$true] %s15_s10 }
   0x3   :  { %18 = dma.hbm_to_vmem [thread:$0]  %s14_s8, 128, %s16_s10, [#allocation3]  }
   0x4   :  { %92 = dma.done.wait [#allocation3], 128  }
   0x5   :  { %93 = vsyncadd [#allocation3], 4294967168  ;;  %s97_s11 = smov [#allocation5]   ;;  %s32_s15 = sshll.u32 %s115_s1, 4  ;;  %v23_v0 = vld [vmem:[#allocation2] sm:$0xff]  ;;  %s33_s15 = int_to_ptr.hbm [resolvable:$true] %s32_s15 }
   0x6   :  { %s30_s12 = sshll.u32 %s97_s11, 4  ;;  %24 = vst [vmem:[#allocation5] sm:$0xff] %v23_v0  ;;  %s31_s12 = int_to_ptr.vmem [resolvable:$true] %s30_s12 }
   0x7   :  { %35 = dma.vmem_to_hbm [thread:$0]  %s31_s12, 128, %s33_s15, [#allocation4]  }
   0x8   :  { %94 = dma.done.wait [#allocation4], 128  }
   0x9   :  { %95 = vsyncadd [#allocation4], 4294967168 }
   0xa   :  { %40 = vsyncpa [#allocation3], 1 }
   0xb   :  { %41 = vsyncpa [#allocation4], 1 }

</bundles_post_ra>
